<compile_context>
chip_gen: v7x
topology: tpu7x:2x2x1
jax: 0.10.0
libtpu: 0.0.40
codegen_flags: <defaults>
</compile_context>

<pallas_src>
import functools
import math

import jax
import jax.numpy as jnp
from jax.experimental import pallas as pl
from jax.experimental.pallas import tpu as pltpu

LATENT_DIM = 8
HIDDEN_DIM = 64
IN_DIM = LATENT_DIM + 6          # 14
MAX_ROW_TILE = 4096              # rows per grid step (multiple of 128)


def _round_up(x, m):
    return (x + m - 1) // m * m


def _choose_row_tile(n_rows):
    """Row tile: as large as possible (amortize per-step overhead) but split
    into >=2 grid steps when there is enough work (v7x has 2 TensorCores)."""
    padded = _round_up(max(n_rows, 1), 128)
    n_tiles = max(pl.cdiv(padded, MAX_ROW_TILE), 2 if padded >= 256 else 1)
    return _round_up(pl.cdiv(padded, n_tiles), 128)


def _mlp_kernel(x_ref, wi_ref, wo_ref,
                w1a_ref, w1b_ref, w1c_ref, b1_ref,
                w2_ref, b2_ref,
                w3_ref, b3_ref,
                w4_ref, b4_ref,
                w5_ref, b5_ref,
                o_ref):
    """Fused 5-layer MLP on one (ROW_TILE, .) tile of rows."""
    x = x_ref[...].astype(jnp.bfloat16)
    wi = wi_ref[...].astype(jnp.bfloat16)
    wo = wo_ref[...].astype(jnp.bfloat16)

    # Layer 1: concat([x, w_i, w_o]) @ W1 expressed with W1 split row-wise,
    # so no concatenated z is ever materialized in HBM or VMEM.
    h = (jnp.dot(x, w1a_ref[...], preferred_element_type=jnp.float32)
         + jnp.dot(wi, w1b_ref[...], preferred_element_type=jnp.float32)
         + jnp.dot(wo, w1c_ref[...], preferred_element_type=jnp.float32)
         + b1_ref[...])
    h = jnp.maximum(h, 0.0).astype(jnp.bfloat16)

    # Layers 2-3: 64 -> 64
    h = jnp.dot(h, w2_ref[...], preferred_element_type=jnp.float32) + b2_ref[...]
    h = jnp.maximum(h, 0.0).astype(jnp.bfloat16)

    h = jnp.dot(h, w3_ref[...], preferred_element_type=jnp.float32) + b3_ref[...]
    h = jnp.maximum(h, 0.0).astype(jnp.bfloat16)

    # Layer 4: 64 -> 6
    h = jnp.dot(h, w4_ref[...], preferred_element_type=jnp.float32) + b4_ref[...]
    h = jnp.maximum(h, 0.0)                       # (T, 6), f32

    # Layer 5 (6 -> 1) on the VPU/XLU instead of a degenerate MXU pass:
    # transpose to (6, T) so the per-row scalar results land on the lane axis,
    # then a sublane reduction. Output store is lane-dense (1, T).
    h_t = h.T                                     # (6, T)  f32, XLU transpose
    out = jnp.sum(h_t * w5_ref[...], axis=0, keepdims=True) + b5_ref[...]  # (1, T)
    o_ref[0] = out.astype(o_ref.dtype)


def _full_spec(shape):
    # Whole-array block, same block for every grid step (fetched once).
    return pl.BlockSpec(shape, lambda i: tuple(0 for _ in shape))


@jax.jit
def texture_decoder_forward(x, w_i, w_o, params):
    """Pallas equivalent of TextureDecoder.forward.

    x:   [..., LATENT_DIM] f32
    w_i: [..., 3] f32
    w_o: [..., 3] f32
    returns [..., 1] f32
    """
    lead_shape = x.shape[:-1]
    n_rows = math.prod(lead_shape) if lead_shape else 1

    x2 = x.reshape(n_rows, LATENT_DIM).astype(jnp.float32)
    wi2 = w_i.reshape(n_rows, 3).astype(jnp.float32)
    wo2 = w_o.reshape(n_rows, 3).astype(jnp.float32)

    row_tile = _choose_row_tile(n_rows)
    n_pad = _round_up(n_rows, row_tile)
    if n_pad != n_rows:
        pad = n_pad - n_rows
        x2 = jnp.pad(x2, ((0, pad), (0, 0)))
        wi2 = jnp.pad(wi2, ((0, pad), (0, 0)))
        wo2 = jnp.pad(wo2, ((0, pad), (0, 0)))

    (w1, b1), (w2, b2), (w3, b3), (w4, b4), (w5, b5) = params
    # Split W1 rows to match torch.cat([x, w_i, w_o], dim=-1) ordering.
    w1a = w1[:LATENT_DIM].astype(jnp.bfloat16)                      # (8, 64)
    w1b = w1[LATENT_DIM:LATENT_DIM + 3].astype(jnp.bfloat16)        # (3, 64)
    w1c = w1[LATENT_DIM + 3:].astype(jnp.bfloat16)                  # (3, 64)
    w2b = w2.astype(jnp.bfloat16)
    w3b = w3.astype(jnp.bfloat16)
    w4b = w4.astype(jnp.bfloat16)
    # w5 stays f32 (6, 1) for the VPU epilogue; biases stay f32.

    n_tiles = n_pad // row_tile
    out = pl.pallas_call(
        _mlp_kernel,
        out_shape=jax.ShapeDtypeStruct((n_tiles, 1, row_tile), jnp.float32),
        grid_spec=pltpu.PrefetchScalarGridSpec(
            num_scalar_prefetch=0,
            grid=(n_tiles,),
            in_specs=[
                pl.BlockSpec((row_tile, LATENT_DIM), lambda i: (i, 0)),
                pl.BlockSpec((row_tile, 3), lambda i: (i, 0)),
                pl.BlockSpec((row_tile, 3), lambda i: (i, 0)),
                _full_spec(w1a.shape), _full_spec(w1b.shape), _full_spec(w1c.shape),
                _full_spec(b1.shape),
                _full_spec(w2b.shape), _full_spec(b2.shape),
                _full_spec(w3b.shape), _full_spec(b3.shape),
                _full_spec(w4b.shape), _full_spec(b4.shape),
                _full_spec(w5.shape), _full_spec(b5.shape),
            ],
            out_specs=pl.BlockSpec((1, 1, row_tile), lambda i: (i, 0, 0)),
        ),
        compiler_params=pltpu.CompilerParams(
            dimension_semantics=("parallel",)),
    )(x2, wi2, wo2, w1a, w1b, w1c, b1, w2b, b2, w3b, b3, w4b, b4, w5, b5)

    flat = out.reshape(n_pad)[:n_rows]
    return flat.reshape(*lead_shape, 1)


def init_params(key, latent_dim=LATENT_DIM, hidden_dim=HIDDEN_DIM):
    """Deterministic init mimicking PyTorch nn.Linear defaults:
       W, b ~ U(-1/sqrt(fan_in), 1/sqrt(fan_in)).
       Weights stored as (in, out) so the kernel does z @ W + b."""
    dims = [(latent_dim + 6, hidden_dim),
            (hidden_dim, hidden_dim),
            (hidden_dim, hidden_dim),
            (hidden_dim, 6),
            (6, 1)]
    params = []
    for (fan_in, fan_out) in dims:
        key, kw, kb = jax.random.split(key, 3)
        bound = 1.0 / jnp.sqrt(jnp.float32(fan_in))
        w = jax.random.uniform(kw, (fan_in, fan_out), jnp.float32, -bound, bound)
        b = jax.random.uniform(kb, (1, fan_out), jnp.float32, -bound, bound)
        params.append((w, b))
    return params


def _reference_forward(x, w_i, w_o, params):
    """Pure-JAX f32 reference for correctness checking."""
    z = jnp.concatenate([x, w_i, w_o], axis=-1)
    (w1, b1), (w2, b2), (w3, b3), (w4, b4), (w5, b5) = params
    h = jnp.maximum(z @ w1 + b1[0], 0.0)
    h = jnp.maximum(h @ w2 + b2[0], 0.0)
    h = jnp.maximum(h @ w3 + b3[0], 0.0)
    h = jnp.maximum(h @ w4 + b4[0], 0.0)
    return h @ w5 + b5[0]


if __name__ == "__main__":
    key = jax.random.PRNGKey(0)
    key, kx, ki, ko, kp = jax.random.split(key, 5)

    batch, npts = 2, 16
    x = jax.random.normal(kx, (batch, npts, LATENT_DIM), jnp.float32)
    w_i = jax.random.normal(ki, (batch, npts, 3), jnp.float32)
    w_o = jax.random.normal(ko, (batch, npts, 3), jnp.float32)

    params = init_params(kp)

    out = texture_decoder_forward(x, w_i, w_o, params)
    out = jax.block_until_ready(out)

    ref = _reference_forward(x, w_i, w_o, params)
    assert out.shape == (batch, npts, 1), out.shape
    # bf16 matmuls with f32 accumulation -> loosened tolerance vs f32 reference.
    max_err = float(jnp.max(jnp.abs(out - ref)))
    assert jnp.allclose(out, ref, atol=5e-2, rtol=5e-2), ("mismatch", max_err)

    print("KERNEL_OK")
</pallas_src>

<mosaic_0001>
module attributes {stable_mosaic.version = 11 : i64} {
  func.func @_mlp_kernel(%arg0: i32, %arg1: memref<128x8xf32, #tpu.memory_space<vmem>>, %arg2: memref<128x3xf32, #tpu.memory_space<vmem>>, %arg3: memref<128x3xf32, #tpu.memory_space<vmem>>, %arg4: memref<8x64xbf16, #tpu.memory_space<vmem>>, %arg5: memref<3x64xbf16, #tpu.memory_space<vmem>>, %arg6: memref<3x64xbf16, #tpu.memory_space<vmem>>, %arg7: memref<1x64xf32, #tpu.memory_space<vmem>>, %arg8: memref<64x64xbf16, #tpu.memory_space<vmem>>, %arg9: memref<1x64xf32, #tpu.memory_space<vmem>>, %arg10: memref<64x64xbf16, #tpu.memory_space<vmem>>, %arg11: memref<1x64xf32, #tpu.memory_space<vmem>>, %arg12: memref<64x6xbf16, #tpu.memory_space<vmem>>, %arg13: memref<1x6xf32, #tpu.memory_space<vmem>>, %arg14: memref<6x1xf32, #tpu.memory_space<vmem>>, %arg15: memref<1x1xf32, #tpu.memory_space<vmem>>, %arg16: memref<1x1x128xf32, #tpu.memory_space<vmem>>) attributes {dimension_semantics = [#tpu.dimension_semantics<parallel>], iteration_bounds = array<i64: 1>, scalar_prefetch = 0 : i64, scratch_operands = 0 : i64, tpu.core_type = #tpu.core_type<tc>, window_params = [{transform_indices = @transform_0, window_bounds = array<i64: 128, 8>}, {transform_indices = @transform_1, window_bounds = array<i64: 128, 3>}, {transform_indices = @transform_2, window_bounds = array<i64: 128, 3>}, {pipeline_mode = #tpu.pipeline_mode<synchronous>, transform_indices = @transform_3, window_bounds = array<i64: 8, 64>}, {pipeline_mode = #tpu.pipeline_mode<synchronous>, transform_indices = @transform_4, window_bounds = array<i64: 3, 64>}, {pipeline_mode = #tpu.pipeline_mode<synchronous>, transform_indices = @transform_5, window_bounds = array<i64: 3, 64>}, {pipeline_mode = #tpu.pipeline_mode<synchronous>, transform_indices = @transform_6, window_bounds = array<i64: 1, 64>}, {pipeline_mode = #tpu.pipeline_mode<synchronous>, transform_indices = @transform_7, window_bounds = array<i64: 64, 64>}, {pipeline_mode = #tpu.pipeline_mode<synchronous>, transform_indices = @transform_8, window_bounds = array<i64: 1, 64>}, {pipeline_mode = #tpu.pipeline_mode<synchronous>, transform_indices = @transform_9, window_bounds = array<i64: 64, 64>}, {pipeline_mode = #tpu.pipeline_mode<synchronous>, transform_indices = @transform_10, window_bounds = array<i64: 1, 64>}, {pipeline_mode = #tpu.pipeline_mode<synchronous>, transform_indices = @transform_11, window_bounds = array<i64: 64, 6>}, {pipeline_mode = #tpu.pipeline_mode<synchronous>, transform_indices = @transform_12, window_bounds = array<i64: 1, 6>}, {pipeline_mode = #tpu.pipeline_mode<synchronous>, transform_indices = @transform_13, window_bounds = array<i64: 6, 1>}, {pipeline_mode = #tpu.pipeline_mode<synchronous>, transform_indices = @transform_14, window_bounds = array<i64: 1, 1>}, {transform_indices = @transform_15, window_bounds = array<i64: 1, 1, 128>}]} {
    %c0 = arith.constant 0 : index
    %c0_0 = arith.constant 0 : index
    %0 = vector.load %arg1[%c0, %c0_0] : memref<128x8xf32, #tpu.memory_space<vmem>>, vector<128x8xf32>
    %1 = arith.truncf %0 : vector<128x8xf32> to vector<128x8xbf16>
    %c0_1 = arith.constant 0 : index
    %c0_2 = arith.constant 0 : index
    %2 = vector.load %arg2[%c0_1, %c0_2] : memref<128x3xf32, #tpu.memory_space<vmem>>, vector<128x3xf32>
    %3 = arith.truncf %2 : vector<128x3xf32> to vector<128x3xbf16>
    %c0_3 = arith.constant 0 : index
    %c0_4 = arith.constant 0 : index
    %4 = vector.load %arg3[%c0_3, %c0_4] : memref<128x3xf32, #tpu.memory_space<vmem>>, vector<128x3xf32>
    %5 = arith.truncf %4 : vector<128x3xf32> to vector<128x3xbf16>
    %c0_5 = arith.constant 0 : index
    %c0_6 = arith.constant 0 : index
    %6 = vector.load %arg4[%c0_5, %c0_6] : memref<8x64xbf16, #tpu.memory_space<vmem>>, vector<8x64xbf16>
    %cst = arith.constant dense<0.000000e+00> : vector<128x64xf32>
    %7 = tpu.matmul %1, %6, %cst {dimension_numbers = #tpu.dot_dimension_numbers<[1], [0], [0], [1], [0, 0, 1, 1], [], []>} : vector<128x8xbf16>, vector<8x64xbf16>, vector<128x64xf32> -> vector<128x64xf32>
    %c0_7 = arith.constant 0 : index
    %c0_8 = arith.constant 0 : index
    %8 = vector.load %arg5[%c0_7, %c0_8] : memref<3x64xbf16, #tpu.memory_space<vmem>>, vector<3x64xbf16>
    %cst_9 = arith.constant dense<0.000000e+00> : vector<128x64xf32>
    %9 = tpu.matmul %3, %8, %cst_9 {dimension_numbers = #tpu.dot_dimension_numbers<[1], [0], [0], [1], [0, 0, 1, 1], [], []>} : vector<128x3xbf16>, vector<3x64xbf16>, vector<128x64xf32> -> vector<128x64xf32>
    %10 = arith.addf %7, %9 : vector<128x64xf32>
    %c0_10 = arith.constant 0 : index
    %c0_11 = arith.constant 0 : index
    %11 = vector.load %arg6[%c0_10, %c0_11] : memref<3x64xbf16, #tpu.memory_space<vmem>>, vector<3x64xbf16>
    %cst_12 = arith.constant dense<0.000000e+00> : vector<128x64xf32>
    %12 = tpu.matmul %5, %11, %cst_12 {dimension_numbers = #tpu.dot_dimension_numbers<[1], [0], [0], [1], [0, 0, 1, 1], [], []>} : vector<128x3xbf16>, vector<3x64xbf16>, vector<128x64xf32> -> vector<128x64xf32>
    %13 = arith.addf %10, %12 : vector<128x64xf32>
    %c0_13 = arith.constant 0 : index
    %c0_14 = arith.constant 0 : index
    %14 = vector.load %arg7[%c0_13, %c0_14] : memref<1x64xf32, #tpu.memory_space<vmem>>, vector<1x64xf32>
    %15 = vector.broadcast %14 : vector<1x64xf32> to vector<128x64xf32>
    %16 = arith.addf %13, %15 : vector<128x64xf32>
    %cst_15 = arith.constant 0.000000e+00 : f32
    %17 = vector.broadcast %cst_15 : f32 to vector<128x64xf32>
    %18 = arith.maximumf %16, %17 : vector<128x64xf32>
    %19 = arith.truncf %18 : vector<128x64xf32> to vector<128x64xbf16>
    %c0_16 = arith.constant 0 : index
    %c0_17 = arith.constant 0 : index
    %20 = vector.load %arg8[%c0_16, %c0_17] : memref<64x64xbf16, #tpu.memory_space<vmem>>, vector<64x64xbf16>
    %cst_18 = arith.constant dense<0.000000e+00> : vector<128x64xf32>
    %21 = tpu.matmul %19, %20, %cst_18 {dimension_numbers = #tpu.dot_dimension_numbers<[1], [0], [0], [1], [0, 0, 1, 1], [], []>} : vector<128x64xbf16>, vector<64x64xbf16>, vector<128x64xf32> -> vector<128x64xf32>
    %c0_19 = arith.constant 0 : index
    %c0_20 = arith.constant 0 : index
    %22 = vector.load %arg9[%c0_19, %c0_20] : memref<1x64xf32, #tpu.memory_space<vmem>>, vector<1x64xf32>
    %23 = vector.broadcast %22 : vector<1x64xf32> to vector<128x64xf32>
    %24 = arith.addf %21, %23 : vector<128x64xf32>
    %cst_21 = arith.constant 0.000000e+00 : f32
    %25 = vector.broadcast %cst_21 : f32 to vector<128x64xf32>
    %26 = arith.maximumf %24, %25 : vector<128x64xf32>
    %27 = arith.truncf %26 : vector<128x64xf32> to vector<128x64xbf16>
    %c0_22 = arith.constant 0 : index
    %c0_23 = arith.constant 0 : index
    %28 = vector.load %arg10[%c0_22, %c0_23] : memref<64x64xbf16, #tpu.memory_space<vmem>>, vector<64x64xbf16>
    %cst_24 = arith.constant dense<0.000000e+00> : vector<128x64xf32>
    %29 = tpu.matmul %27, %28, %cst_24 {dimension_numbers = #tpu.dot_dimension_numbers<[1], [0], [0], [1], [0, 0, 1, 1], [], []>} : vector<128x64xbf16>, vector<64x64xbf16>, vector<128x64xf32> -> vector<128x64xf32>
    %c0_25 = arith.constant 0 : index
    %c0_26 = arith.constant 0 : index
    %30 = vector.load %arg11[%c0_25, %c0_26] : memref<1x64xf32, #tpu.memory_space<vmem>>, vector<1x64xf32>
    %31 = vector.broadcast %30 : vector<1x64xf32> to vector<128x64xf32>
    %32 = arith.addf %29, %31 : vector<128x64xf32>
    %cst_27 = arith.constant 0.000000e+00 : f32
    %33 = vector.broadcast %cst_27 : f32 to vector<128x64xf32>
    %34 = arith.maximumf %32, %33 : vector<128x64xf32>
    %35 = arith.truncf %34 : vector<128x64xf32> to vector<128x64xbf16>
    %c0_28 = arith.constant 0 : index
    %c0_29 = arith.constant 0 : index
    %36 = vector.load %arg12[%c0_28, %c0_29] : memref<64x6xbf16, #tpu.memory_space<vmem>>, vector<64x6xbf16>
    %cst_30 = arith.constant dense<0.000000e+00> : vector<128x6xf32>
    %37 = tpu.matmul %35, %36, %cst_30 {dimension_numbers = #tpu.dot_dimension_numbers<[1], [0], [0], [1], [0, 0, 1, 1], [], []>} : vector<128x64xbf16>, vector<64x6xbf16>, vector<128x6xf32> -> vector<128x6xf32>
    %c0_31 = arith.constant 0 : index
    %c0_32 = arith.constant 0 : index
    %38 = vector.load %arg13[%c0_31, %c0_32] : memref<1x6xf32, #tpu.memory_space<vmem>>, vector<1x6xf32>
    %39 = vector.broadcast %38 : vector<1x6xf32> to vector<128x6xf32>
    %40 = arith.addf %37, %39 : vector<128x6xf32>
    %cst_33 = arith.constant 0.000000e+00 : f32
    %41 = vector.broadcast %cst_33 : f32 to vector<128x6xf32>
    %42 = arith.maximumf %40, %41 : vector<128x6xf32>
    %43 = tpu.transpose %42, [1, 0] : vector<128x6xf32> -> vector<6x128xf32>
    %c0_34 = arith.constant 0 : index
    %c0_35 = arith.constant 0 : index
    %44 = vector.load %arg14[%c0_34, %c0_35] : memref<6x1xf32, #tpu.memory_space<vmem>>, vector<6x1xf32>
    %45 = vector.broadcast %44 : vector<6x1xf32> to vector<6x128xf32>
    %46 = arith.mulf %43, %45 : vector<6x128xf32>
    %cst_36 = arith.constant dense<0.000000e+00> : vector<128xf32>
    %47 = vector.multi_reduction <add>, %46, %cst_36 [0] : vector<6x128xf32> to vector<128xf32>
    %48 = vector.shape_cast %47 : vector<128xf32> to vector<1x128xf32>
    %c0_37 = arith.constant 0 : index
    %c0_38 = arith.constant 0 : index
    %49 = vector.load %arg15[%c0_37, %c0_38] : memref<1x1xf32, #tpu.memory_space<vmem>>, vector<1x1xf32>
    %50 = vector.broadcast %49 : vector<1x1xf32> to vector<1x128xf32>
    %51 = arith.addf %48, %50 : vector<1x128xf32>
    %c0_39 = arith.constant 0 : index
    %c0_40 = arith.constant 0 : index
    %c0_41 = arith.constant 0 : index
    %52 = vector.load %arg16[%c0_39, %c0_40, %c0_41] : memref<1x1x128xf32, #tpu.memory_space<vmem>>, vector<1x1x128xf32>
    %53 = vector.shape_cast %52 : vector<1x1x128xf32> to vector<1x128xf32>
    %54 = vector.shape_cast %51 : vector<1x128xf32> to vector<1x1x128xf32>
    tpu.vector_store %arg16[%c0_39, %c0_40, %c0_41], %54 {strides = array<i32>} : memref<1x1x128xf32, #tpu.memory_space<vmem>>, vector<1x1x128xf32>,
    return
  }
  func.func @transform_0(%arg0: i32) -> (i32, i32) {
    %c0_i32 = arith.constant 0 : i32
    %c0_i32_0 = arith.constant 0 : i32
    return %arg0, %c0_i32 : i32, i32
  }
  func.func @transform_1(%arg0: i32) -> (i32, i32) {
    %c0_i32 = arith.constant 0 : i32
    %c0_i32_0 = arith.constant 0 : i32
    return %arg0, %c0_i32 : i32, i32
  }
  func.func @transform_2(%arg0: i32) -> (i32, i32) {
    %c0_i32 = arith.constant 0 : i32
    %c0_i32_0 = arith.constant 0 : i32
    return %arg0, %c0_i32 : i32, i32
  }
  func.func @transform_3(%arg0: i32) -> (i32, i32) {
    %c0_i32 = arith.constant 0 : i32
    %c0_i32_0 = arith.constant 0 : i32
    %c0_i32_1 = arith.constant 0 : i32
    return %c0_i32, %c0_i32_0 : i32, i32
  }
  func.func @transform_4(%arg0: i32) -> (i32, i32) {
    %c0_i32 = arith.constant 0 : i32
    %c0_i32_0 = arith.constant 0 : i32
    %c0_i32_1 = arith.constant 0 : i32
    return %c0_i32, %c0_i32_0 : i32, i32
  }
  func.func @transform_5(%arg0: i32) -> (i32, i32) {
    %c0_i32 = arith.constant 0 : i32
    %c0_i32_0 = arith.constant 0 : i32
    %c0_i32_1 = arith.constant 0 : i32
    return %c0_i32, %c0_i32_0 : i32, i32
  }
  func.func @transform_6(%arg0: i32) -> (i32, i32) {
    %c0_i32 = arith.constant 0 : i32
    %c0_i32_0 = arith.constant 0 : i32
    %c0_i32_1 = arith.constant 0 : i32
    return %c0_i32, %c0_i32_0 : i32, i32
  }
  func.func @transform_7(%arg0: i32) -> (i32, i32) {
    %c0_i32 = arith.constant 0 : i32
    %c0_i32_0 = arith.constant 0 : i32
    %c0_i32_1 = arith.constant 0 : i32
    return %c0_i32, %c0_i32_0 : i32, i32
  }
  func.func @transform_8(%arg0: i32) -> (i32, i32) {
    %c0_i32 = arith.constant 0 : i32
    %c0_i32_0 = arith.constant 0 : i32
    %c0_i32_1 = arith.constant 0 : i32
    return %c0_i32, %c0_i32_0 : i32, i32
  }
  func.func @transform_9(%arg0: i32) -> (i32, i32) {
    %c0_i32 = arith.constant 0 : i32
    %c0_i32_0 = arith.constant 0 : i32
    %c0_i32_1 = arith.constant 0 : i32
    return %c0_i32, %c0_i32_0 : i32, i32
  }
  func.func @transform_10(%arg0: i32) -> (i32, i32) {
    %c0_i32 = arith.constant 0 : i32
    %c0_i32_0 = arith.constant 0 : i32
    %c0_i32_1 = arith.constant 0 : i32
    return %c0_i32, %c0_i32_0 : i32, i32
  }
  func.func @transform_11(%arg0: i32) -> (i32, i32) {
    %c0_i32 = arith.constant 0 : i32
    %c0_i32_0 = arith.constant 0 : i32
    %c0_i32_1 = arith.constant 0 : i32
    return %c0_i32, %c0_i32_0 : i32, i32
  }
  func.func @transform_12(%arg0: i32) -> (i32, i32) {
    %c0_i32 = arith.constant 0 : i32
    %c0_i32_0 = arith.constant 0 : i32
    %c0_i32_1 = arith.constant 0 : i32
    return %c0_i32, %c0_i32_0 : i32, i32
  }
  func.func @transform_13(%arg0: i32) -> (i32, i32) {
    %c0_i32 = arith.constant 0 : i32
    %c0_i32_0 = arith.constant 0 : i32
    %c0_i32_1 = arith.constant 0 : i32
    return %c0_i32, %c0_i32_0 : i32, i32
  }
  func.func @transform_14(%arg0: i32) -> (i32, i32) {
    %c0_i32 = arith.constant 0 : i32
    %c0_i32_0 = arith.constant 0 : i32
    %c0_i32_1 = arith.constant 0 : i32
    return %c0_i32, %c0_i32_0 : i32, i32
  }
  func.func @transform_15(%arg0: i32) -> (i32, i32, i32) {
    %c0_i32 = arith.constant 0 : i32
    %c0_i32_0 = arith.constant 0 : i32
    %c0_i32_1 = arith.constant 0 : i32
    return %arg0, %c0_i32, %c0_i32_0 : i32, i32, i32
  }
}

</mosaic_0001>

<bundles_post_ra>
// kernel: texture_decoder_forward.1
= control target key start
LH: loop header
LB: loop body
LE: loop exit
PB: predicated region body
PF: predicated region fallthrough
CT: control target
= control target key end

     0   :  { %vm152_vm0 = vcmask 1040384   ;;  %vm153_vm1 = vcmask 1041408   ;;  %v1479_v1 = vmov 65535   ;;  %vm127_vm2 = vcmask 23552   ;;  %s1855_s4 = inlined_call_operand.vmem [shape: bf16[3,64], index: 4, kind: input, shape index: {}]   ;;  %s1856_s1 = inlined_call_operand.vmem [shape: f32[128,3], index: 1, kind: input, shape index: {}]   ;;  %s1857_s5 = inlined_call_operand.vmem [shape: bf16[3,64], index: 5, kind: input, shape index: {}]   ;;  %s1858_s3 = inlined_call_operand.vmem [shape: bf16[8,64], index: 3, kind: input, shape index: {}]   ;;  %s1859_s7 = inlined_call_operand.vmem [shape: bf16[64,64], index: 7, kind: input, shape index: {}]   ;;  %s1860_s0 = inlined_call_operand.vmem [shape: f32[128,8], index: 0, kind: input, shape index: {}]   ;;  %s1861_s2 = inlined_call_operand.vmem [shape: f32[128,3], index: 2, kind: input, shape index: {}]   ;;  %s1862_s9 = inlined_call_operand.vmem [shape: bf16[64,64], index: 9, kind: input, shape index: {}]   ;;  %s1863_s6 = inlined_call_operand.vmem [shape: f32[1,64], index: 6, kind: input, shape index: {}]   ;;  %s1864_s11 = inlined_call_operand.vmem [shape: bf16[64,6], index: 11, kind: input, shape index: {}]   ;;  %s1865_s8 = inlined_call_operand.vmem [shape: f32[1,64], index: 8, kind: input, shape index: {}]   ;;  %s1866_s10 = inlined_call_operand.vmem [shape: f32[1,64], index: 10, kind: input, shape index: {}]   ;;  %s1867_s14 = inlined_call_operand.<no memory space> [shape: f32[1,1], index: 14, kind: input, shape index: {}]   ;;  %s1868_s13 = inlined_call_operand.vmem [shape: f32[6,1], index: 13, kind: input, shape index: {}]   ;;  %s1869_s12 = inlined_call_operand.vmem [shape: f32[1,6], index: 12, kind: input, shape index: {}]   ;;  %s1870_s15 = inlined_call_operand.vmem [shape: f32[1,1,128], index: 15, kind: output, shape index: {}]  }
   0x1   :  { %v126_v0 = vld [vmem:[%s1855_s4] sm:$0x3]  ;;  %v154_v2 = vsel %vm152_vm0, 4294967295, %v1479_v1  ;;  %v78_v5 = vld [vmem:[%s1856_s1 + $0x8] sm:$0xff]  ;;  %v79_v6 = vld [vmem:[%s1856_s1 + $0x10] sm:$0xff]  ;;  %vm281_vm3 = vcmask 1043456  }
   0x2   :  { %v77_v3 = vld [vmem:[%s1856_s1] sm:$0xff]  ;;  %v155_v4 = vsel %vm153_vm1, %v154_v2, 0  ;;  %v80_v7 = vld [vmem:[%s1856_s1 + $0x18] sm:$0xff]  ;;  %v82_v11 = vld [vmem:[%s1856_s1 + $0x28] sm:$0xff]  ;;  %vm256_vm4 = vcmask 64512   ;;  %vm609_vm5 = vcmask 523264  }
   0x3   :  { %v157_v8 = vand.u32 %v155_v4, %v126_v0  ;;  %v93_v9 = vpack.c.bf16 %v78_v5, %v77_v3  ;;  %v81_v10 = vld [vmem:[%s1856_s1 + $0x20] sm:$0xff]  ;;  %v94_v14 = vpack.c.bf16 %v80_v7, %v79_v6  ;;  %v83_v18 = vld [vmem:[%s1856_s1 + $0x30] sm:$0xff]  ;;  %v84_v19 = vld [vmem:[%s1856_s1 + $0x38] sm:$0xff]  ;;  %vm1154_vm6 = vcmask 1045504  }
   0x4   :  { %v382_v12 = vld [vmem:[%s1857_s5] sm:$0x3]  ;;  %v95_v15 = vpack.c.bf16 %v82_v11, %v81_v10  ;;  %v86_v21 = vld [vmem:[%s1856_s1 + $0x48] sm:$0xff]  ;;  %v96_v22 = vpack.c.bf16 %v84_v19, %v83_v18  ;;  %v87_v24 = vld [vmem:[%s1856_s1 + $0x50] sm:$0xff] }
   0x5   :  { %v125_v13 = vld [vmem:[%s1858_s3] sm:$0xf]  ;;  %1305 = vmatprep.subr.bf16.mxu0 %v157_v8  ;;  %1307 = vmatprep.mubr.msk.bf16.mxu0 %vm127_vm2, %v93_v9  ;;  %v408_v16 = vand.u32 %v382_v12, %v155_v4  ;;  %v88_v25 = vld [vmem:[%s1856_s1 + $0x58] sm:$0xff]  ;;  %v90_v27 = vld [vmem:[%s1856_s1 + $0x68] sm:$0xff] }
   0x6   :  { %1306 = vmatpush3.bf16.msra.mxu0 %v157_v8  ;;  %v283_v17 = vsel %vm281_vm3, %v125_v13, 0  ;;  %v85_v20 = vld [vmem:[%s1856_s1 + $0x40] sm:$0xff]  ;;  %v1468_v29 = vld [vmem:[%s1859_s7 + $0x8] sm:$0xff]   ;;  %v98_v30 = vpack.c.bf16 %v88_v25, %v87_v24  ;;  %v91_v32 = vld [vmem:[%s1856_s1 + $0x70] sm:$0xff] }
   0x7   :  { %1463 = vmatprep.subr.msk.bf16.mxu0 %vm281_vm3, %v125_v13  ;;  %v97_v23 = vpack.c.bf16 %v86_v21, %v85_v20  ;;  %v89_v26 = vld [vmem:[%s1856_s1 + $0x60] sm:$0xff]  ;;  %v92_v33 = vld [vmem:[%s1856_s1 + $0x78] sm:$0xff]  ;;  %v54_v35 = vld [vmem:[%s1860_s0 + $0x8] sm:$0xff] }
   0x8   :  { %v1467_v28 = vld [vmem:[%s1859_s7] sm:$0xff]   ;;  %v99_v31 = vpack.c.bf16 %v90_v27, %v89_v26  ;;  %v100_v36 = vpack.c.bf16 %v92_v33, %v91_v32  ;;  %v55_v38 = vld [vmem:[%s1860_s0 + $0x10] sm:$0xff]  ;;  %v56_v39 = vld [vmem:[%s1860_s0 + $0x18] sm:$0xff] }
   0x9   :  { %1308 = vmatmul.mubr.msk.bf16.vlgmr.msra.gmra.mrb[0].mxu0 %vm127_vm2, %v94_v14  ;;  %1359 = vmatprep.subr.bf16.mxu1 %v1467_v28  ;;  %v53_v34 = vld [vmem:[%s1860_s0] sm:$0xff]  ;;  %v58_v41 = vld [vmem:[%s1860_s0 + $0x28] sm:$0xff]  ;;  %v70_v42 = vpack.c.bf16 %v56_v39, %v55_v38  ;;  %v59_v44 = vld [vmem:[%s1860_s0 + $0x30] sm:$0xff] }
   0xa   :  { %1324 = vmatpush3.bf16.msra.mxu0 %v283_v17  ;;  %1311 = vmatprep.mubr.msk.bf16.mxu0 %vm127_vm2, %v95_v15  ;;  %v69_v37 = vpack.c.bf16 %v54_v35, %v53_v34  ;;  %v57_v40 = vld [vmem:[%s1860_s0 + $0x20] sm:$0xff]  ;;  %v60_v45 = vld [vmem:[%s1860_s0 + $0x38] sm:$0xff]  ;;  %v62_v47 = vld [vmem:[%s1860_s0 + $0x48] sm:$0xff] }
   0xb   :  { %1341 = vmatprep.subr.bf16.mxu0 %v408_v16  ;;  %1360 = vmatpush3.bf16.msra.mxu1 %v1467_v28  ;;  %v71_v43 = vpack.c.bf16 %v58_v41, %v57_v40  ;;  %v61_v46 = vld [vmem:[%s1860_s0 + $0x40] sm:$0xff]  ;;  %v72_v48 = vpack.c.bf16 %v60_v45, %v59_v44  ;;  %v63_v50 = vld [vmem:[%s1860_s0 + $0x50] sm:$0xff]  ;;  %v64_v51 = vld [vmem:[%s1860_s0 + $0x58] sm:$0xff] }
   0xc   :  { %1361 = vmatprep.subr.bf16.mxu1 %v1468_v29  ;;  %v73_v49 = vpack.c.bf16 %v62_v47, %v61_v46  ;;  %v65_v52 = vld [vmem:[%s1860_s0 + $0x60] sm:$0xff]  ;;  %v66_v53 = vld [vmem:[%s1860_s0 + $0x68] sm:$0xff]  ;;  %v74_v54 = vpack.c.bf16 %v64_v51, %v63_v50  ;;  %v67_v56 = vld [vmem:[%s1860_s0 + $0x70] sm:$0xff] }
   0xd   :  { %v75_v55 = vpack.c.bf16 %v66_v53, %v65_v52  ;;  %v68_v57 = vld [vmem:[%s1860_s0 + $0x78] sm:$0xff]  ;;  %v101_v58 = vld [vmem:[%s1861_s2] sm:$0xff]  ;;  %v102_v59 = vld [vmem:[%s1861_s2 + $0x8] sm:$0xff] }
   0xe   :  { %v76_v60 = vpack.c.bf16 %v68_v57, %v67_v56  ;;  %v117_v61 = vpack.c.bf16 %v102_v59, %v101_v58  ;;  %v103_v62 = vld [vmem:[%s1861_s2 + $0x10] sm:$0xff]  ;;  %v104_v63 = vld [vmem:[%s1861_s2 + $0x18] sm:$0xff]  ;;  %v105_v0 = vld [vmem:[%s1861_s2 + $0x20] sm:$0xff] }
   0xf   :  { %1362 = vmatpush3.bf16.msra.mxu1 %v1468_v29  ;;  %v106_v1 = vld [vmem:[%s1861_s2 + $0x28] sm:$0xff]  ;;  %v118_v2 = vpack.c.bf16 %v104_v63, %v103_v62  ;;  %v107_v4 = vld [vmem:[%s1861_s2 + $0x30] sm:$0xff]  ;;  %v108_v5 = vld [vmem:[%s1861_s2 + $0x38] sm:$0xff] }
  0x10   :  { %v119_v3 = vpack.c.bf16 %v106_v1, %v105_v0  ;;  %v109_v6 = vld [vmem:[%s1861_s2 + $0x40] sm:$0xff]  ;;  %v110_v7 = vld [vmem:[%s1861_s2 + $0x48] sm:$0xff]  ;;  %v120_v8 = vpack.c.bf16 %v108_v5, %v107_v4  ;;  %v111_v10 = vld [vmem:[%s1861_s2 + $0x50] sm:$0xff] }
  0x11   :  { %1312 = vmatmul.mubr.msk.bf16.gmra.mrb[4].mxu0 %vm127_vm2, %v96_v22  ;;  %v121_v9 = vpack.c.bf16 %v110_v7, %v109_v6  ;;  %v112_v11 = vld [vmem:[%s1861_s2 + $0x58] sm:$0xff]  ;;  %v113_v12 = vld [vmem:[%s1861_s2 + $0x60] sm:$0xff]  ;;  %v114_v13 = vld [vmem:[%s1861_s2 + $0x68] sm:$0xff] }
  0x12   :  { %1315 = vmatprep.mubr.msk.bf16.mxu0 %vm127_vm2, %v97_v23  ;;  %v122_v14 = vpack.c.bf16 %v112_v11, %v111_v10  ;;  %v123_v15 = vpack.c.bf16 %v114_v13, %v113_v12  ;;  %v116_v17 = vld [vmem:[%s1861_s2 + $0x78] sm:$0xff]  ;;  %v1469_v19 = vld [vmem:[%s1859_s7 + $0x10] sm:$0xff]   ;;  %v1471_v21 = vld [vmem:[%s1862_s9] sm:$0xff]  }
  0x13   :  { %1363 = vmatprep.subr.bf16.mxu1 %v1469_v19  ;;  %v1470_v20 = vld [vmem:[%s1859_s7 + $0x18] sm:$0xff]   ;;  %v1756_v22 = vld [vmem:[%s1863_s6] ss:$0 sm:$0xff]  ;;  %v1472_v40 = vld [vmem:[%s1862_s9 + $0x8] sm:$0xff]  }
  0x14   :  { %1364 = vmatpush3.bf16.msra.mxu1 %v1469_v19  ;;  %v1797_v19 = vld [vmem:[%s1865_s8] ss:$0 sm:$0xff] }
  0x15   :  { %1365 = vmatprep.subr.bf16.mxu1 %v1470_v20 }
  0x18   :  { %1366 = vmatpush3.bf16.msra.mxu1 %v1470_v20 }
  0x19   :  { %1316 = vmatmul.mubr.msk.bf16.gmra.mrb[8].mxu0 %vm127_vm2, %v98_v30  ;;  %1383 = vmatprep.subr.bf16.mxu1 %v1471_v21 }
  0x1a   :  { %1319 = vmatprep.mubr.msk.bf16.mxu0 %vm127_vm2, %v99_v31 }
  0x21   :  { %1320 = vmatmul.mubr.msk.bf16.gmra.mrb[12].mxu0 %vm127_vm2, %v100_v36 }
  0x22   :  { %1325 = vmatprep.mubr.msk.bf16.mxu0 %vm256_vm4, %v69_v37 }
  0x29   :  { %1326 = vmatmul.mubr.msk.bf16.vlgmr.msra.gmra.mrb[0].mxu0 %vm256_vm4, %v70_v42 }
  0x2a   :  { %1342 = vmatpush3.bf16.msra.mxu0 %v408_v16  ;;  %1329 = vmatprep.mubr.msk.bf16.mxu0 %vm256_vm4, %v71_v43  ;;  %v115_v16 = vld [vmem:[%s1861_s2 + $0x70] sm:$0xff] }
  0x2b   :  { %v124_v18 = vpack.c.bf16 %v116_v17, %v115_v16  ;;  %v1474_v17 = vld [vmem:[%s1862_s9 + $0x18] sm:$0xff]  }
  0x31   :  { %1330 = vmatmul.mubr.msk.bf16.gmra.mrb[4].mxu0 %vm256_vm4, %v72_v48  ;;  %v1473_v48 = vld [vmem:[%s1862_s9 + $0x10] sm:$0xff]  }
  0x32   :  { %1333 = vmatprep.mubr.msk.bf16.mxu0 %vm256_vm4, %v73_v49 }
  0x39   :  { %1334 = vmatmul.mubr.msk.bf16.gmra.mrb[8].mxu0 %vm256_vm4, %v74_v54 }
  0x3a   :  { %1337 = vmatprep.mubr.msk.bf16.mxu0 %vm256_vm4, %v75_v55 }
  0x41   :  { %1338 = vmatmul.mubr.msk.bf16.gmra.mrb[12].mxu0 %vm256_vm4, %v76_v60 }
  0x42   :  { %1343 = vmatprep.mubr.msk.bf16.mxu0 %vm127_vm2, %v117_v61 }
  0x49   :  { %1344 = vmatmul.mubr.msk.bf16.vlgmr.msra.gmra.mrb[0].mxu0 %vm127_vm2, %v118_v2 }
  0x4a   :  { %1347 = vmatprep.mubr.msk.bf16.mxu0 %vm127_vm2, %v119_v3 }
  0x51   :  { %1348 = vmatmul.mubr.msk.bf16.gmra.mrb[4].mxu0 %vm127_vm2, %v120_v8 }
  0x52   :  { %1351 = vmatprep.mubr.msk.bf16.mxu0 %vm127_vm2, %v121_v9 }
  0x59   :  { %1352 = vmatmul.mubr.msk.bf16.gmra.mrb[8].mxu0 %vm127_vm2, %v122_v14 }
  0x5a   :  { %1355 = vmatprep.mubr.msk.bf16.mxu0 %vm127_vm2, %v123_v15 }
  0x61   :  { %1356 = vmatmul.mubr.msk.bf16.gmra.mrb[12].mxu0 %vm127_vm2, %v124_v18  ;;  %v1475_v18 = vld [vmem:[%s1864_s11] sm:$0xff]  }
 0x11c   :  { %v1345_v23 = vpop.f32.mrb[0].mxu0 }
 0x11d   :  { %v532_v24 = vadd.f32 %v1345_v23, %v1756_v22  ;;  %v444_v25 = vpop.f32.mrb[1].mxu0 }
 0x11e   :  { %v530_v26 = vadd.f32 %v1756_v22, %v444_v25  ;;  %v1346_v27 = vpop.f32.mrb[2].mxu0 }
 0x11f   :  { %v533_v28 = vadd.f32 %v1346_v27, %v1756_v22  ;;  %v447_v29 = vpop.f32.mrb[3].mxu0  ;;  %v548_v31 = vmax.f32 %v532_v24, 0.0 }
 0x120   :  { %v531_v30 = vadd.f32 %v1756_v22, %v447_v29  ;;  %v546_v33 = vmax.f32 %v530_v26, 0.0 }
 0x121   :  { %v549_v32 = vmax.f32 %v533_v28, 0.0 }
 0x122   :  { %v547_v34 = vmax.f32 %v531_v30, 0.0 }
 0x123   :  { %v563_v35 = vpack.c.bf16 %v549_v32, %v548_v31 }
 0x124   :  { %v1349_v36 = vpop.f32.mrb[4].mxu0  ;;  %v562_v37 = vpack.c.bf16 %v547_v34, %v546_v33 }
 0x125   :  { %v536_v38 = vadd.f32 %v1349_v36, %v1756_v22  ;;  %v460_v39 = vpop.f32.mrb[5].mxu0 }
 0x126   :  { %v534_v41 = vadd.f32 %v1756_v22, %v460_v39  ;;  %v1350_v42 = vpop.f32.mrb[6].mxu0  ;;  %1367 = vmatprep.mubr.msk.bf16.mxu1 %vm609_vm5, %v562_v37  ;;  %v1476_v37 = vld [vmem:[%s1864_s11 + $0x8] sm:$0xff]  }
 0x127   :  { %v537_v43 = vadd.f32 %v1350_v42, %v1756_v22  ;;  %v463_v44 = vpop.f32.mrb[7].mxu0  ;;  %1368 = vmatmul.mubr.msk.bf16.vlgmr.msra.gmra.mrb[0].mxu1 %vm609_vm5, %v563_v35  ;;  %v552_v46 = vmax.f32 %v536_v38, 0.0 }
 0x128   :  { %v535_v45 = vadd.f32 %v1756_v22, %v463_v44  ;;  %1384 = vmatpush3.bf16.msra.mxu1 %v1471_v21  ;;  %v550_v49 = vmax.f32 %v534_v41, 0.0 }
 0x129   :  { %v553_v47 = vmax.f32 %v537_v43, 0.0  ;;  %1385 = vmatprep.subr.bf16.mxu1 %v1472_v40 }
 0x12a   :  { %v551_v50 = vmax.f32 %v535_v45, 0.0  ;;  %v1477_v45 = vld [vmem:[%s1864_s11 + $0x10] sm:$0xff]  }
 0x12b   :  { %v565_v51 = vpack.c.bf16 %v553_v47, %v552_v46 }
 0x12c   :  { %v564_v52 = vpack.c.bf16 %v551_v50, %v550_v49  ;;  %v1353_v53 = vpop.f32.mrb[8].mxu0  ;;  %1386 = vmatpush3.bf16.msra.mxu1 %v1472_v40 }
 0x12d   :  { %v540_v54 = vadd.f32 %v1353_v53, %v1756_v22  ;;  %v476_v55 = vpop.f32.mrb[9].mxu0  ;;  %1387 = vmatprep.subr.bf16.mxu1 %v1473_v48 }
 0x12e   :  { %v538_v56 = vadd.f32 %v1756_v22, %v476_v55  ;;  %v1354_v57 = vpop.f32.mrb[10].mxu0  ;;  %1371 = vmatprep.mubr.msk.bf16.mxu1 %vm609_vm5, %v564_v52 }
 0x12f   :  { %v541_v58 = vadd.f32 %v1354_v57, %v1756_v22  ;;  %v479_v59 = vpop.f32.mrb[11].mxu0  ;;  %1372 = vmatmul.mubr.msk.bf16.gmra.mrb[4].mxu1 %vm609_vm5, %v565_v51  ;;  %v556_v61 = vmax.f32 %v540_v54, 0.0 }
 0x130   :  { %v539_v60 = vadd.f32 %v1756_v22, %v479_v59  ;;  %1388 = vmatpush3.bf16.msra.mxu1 %v1473_v48  ;;  %v554_v63 = vmax.f32 %v538_v56, 0.0 }
 0x131   :  { %v557_v62 = vmax.f32 %v541_v58, 0.0  ;;  %1389 = vmatprep.subr.bf16.mxu1 %v1474_v17 }
 0x132   :  { %v555_v0 = vmax.f32 %v539_v60, 0.0 }
 0x133   :  { %v567_v1 = vpack.c.bf16 %v557_v62, %v556_v61 }
 0x134   :  { %v566_v2 = vpack.c.bf16 %v555_v0, %v554_v63  ;;  %v1357_v3 = vpop.f32.mrb[12].mxu0  ;;  %1390 = vmatpush3.bf16.msra.mxu1 %v1474_v17 }
 0x135   :  { %v544_v4 = vadd.f32 %v1357_v3, %v1756_v22  ;;  %v492_v5 = vpop.f32.mrb[13].mxu0  ;;  %1407 = vmatprep.subr.bf16.mxu1 %v1475_v18 }
 0x136   :  { %v542_v6 = vadd.f32 %v1756_v22, %v492_v5  ;;  %v1358_v7 = vpop.f32.mrb[14].mxu0  ;;  %1375 = vmatprep.mubr.msk.bf16.mxu1 %vm609_vm5, %v566_v2 }
 0x137   :  { %v545_v8 = vadd.f32 %v1358_v7, %v1756_v22  ;;  %v495_v9 = vpop.f32.mrb[15].mxu0  ;;  %1376 = vmatmul.mubr.msk.bf16.gmra.mrb[8].mxu1 %vm609_vm5, %v567_v1  ;;  %v560_v11 = vmax.f32 %v544_v4, 0.0 }
 0x138   :  { %v543_v10 = vadd.f32 %v1756_v22, %v495_v9  ;;  %v558_v13 = vmax.f32 %v542_v6, 0.0 }
 0x139   :  { %v561_v12 = vmax.f32 %v545_v8, 0.0 }
 0x13a   :  { %v559_v14 = vmax.f32 %v543_v10, 0.0 }
 0x13b   :  { %v569_v15 = vpack.c.bf16 %v561_v12, %v560_v11 }
 0x13c   :  { %v568_v16 = vpack.c.bf16 %v559_v14, %v558_v13  ;;  %v1478_v14 = vld [vmem:[%s1864_s11 + $0x18] sm:$0xff]  }
 0x13e   :  { %1379 = vmatprep.mubr.msk.bf16.mxu1 %vm609_vm5, %v568_v16 }
 0x13f   :  { %1380 = vmatmul.mubr.msk.bf16.gmra.mrb[12].mxu1 %vm609_vm5, %v569_v15  ;;  %v1216_v15 = vld [vmem:[%s1866_s10] ss:$0 sm:$0xff] }
 0x1fa   :  { %v1369_v20 = vpop.f32.mrb[0].mxu1 }
 0x1fb   :  { %v677_v21 = vadd.f32 %v1369_v20, %v1797_v19  ;;  %v668_v22 = vpop.f32.mrb[1].mxu1 }
 0x1fc   :  { %v669_v23 = vadd.f32 %v1797_v19, %v668_v22  ;;  %v1370_v24 = vpop.f32.mrb[2].mxu1 }
 0x1fd   :  { %v680_v25 = vadd.f32 %v1370_v24, %v1797_v19  ;;  %v671_v26 = vpop.f32.mrb[3].mxu1  ;;  %v733_v28 = vmax.f32 %v677_v21, 0.0 }
 0x1fe   :  { %v672_v27 = vadd.f32 %v1797_v19, %v671_v26  ;;  %v731_v30 = vmax.f32 %v669_v23, 0.0 }
 0x1ff   :  { %v734_v29 = vmax.f32 %v680_v25, 0.0 }
 0x200   :  { %v732_v31 = vmax.f32 %v672_v27, 0.0 }
 0x201   :  { %v748_v32 = vpack.c.bf16 %v734_v29, %v733_v28 }
 0x202   :  { %v747_v33 = vpack.c.bf16 %v732_v31, %v731_v30  ;;  %v1373_v34 = vpop.f32.mrb[4].mxu1 }
 0x203   :  { %v693_v35 = vadd.f32 %v1373_v34, %v1797_v19  ;;  %v684_v36 = vpop.f32.mrb[5].mxu1 }
 0x204   :  { %v685_v38 = vadd.f32 %v1797_v19, %v684_v36  ;;  %v1374_v39 = vpop.f32.mrb[6].mxu1  ;;  %1391 = vmatprep.mubr.msk.bf16.mxu1 %vm609_vm5, %v747_v33 }
 0x205   :  { %v696_v40 = vadd.f32 %v1374_v39, %v1797_v19  ;;  %v687_v41 = vpop.f32.mrb[7].mxu1  ;;  %1392 = vmatmul.mubr.msk.bf16.vlgmr.msra.gmra.mrb[16].mxu1 %vm609_vm5, %v748_v32  ;;  %v737_v43 = vmax.f32 %v693_v35, 0.0 }
 0x206   :  { %v688_v42 = vadd.f32 %v1797_v19, %v687_v41  ;;  %1408 = vmatpush3.bf16.msra.mxu1 %v1475_v18  ;;  %v735_v46 = vmax.f32 %v685_v38, 0.0 }
 0x207   :  { %v738_v44 = vmax.f32 %v696_v40, 0.0  ;;  %1409 = vmatprep.subr.bf16.mxu1 %v1476_v37 }
 0x208   :  { %v736_v47 = vmax.f32 %v688_v42, 0.0 }
 0x209   :  { %v750_v48 = vpack.c.bf16 %v738_v44, %v737_v43 }
 0x20a   :  { %v749_v49 = vpack.c.bf16 %v736_v47, %v735_v46  ;;  %v1377_v50 = vpop.f32.mrb[8].mxu1  ;;  %1410 = vmatpush3.bf16.msra.mxu1 %v1476_v37 }
 0x20b   :  { %v709_v51 = vadd.f32 %v1377_v50, %v1797_v19  ;;  %v700_v52 = vpop.f32.mrb[9].mxu1  ;;  %1411 = vmatprep.subr.bf16.mxu1 %v1477_v45 }
 0x20c   :  { %v701_v53 = vadd.f32 %v1797_v19, %v700_v52  ;;  %v1378_v54 = vpop.f32.mrb[10].mxu1  ;;  %1395 = vmatprep.mubr.msk.bf16.mxu1 %vm609_vm5, %v749_v49 }
 0x20d   :  { %v712_v55 = vadd.f32 %v1378_v54, %v1797_v19  ;;  %v703_v56 = vpop.f32.mrb[11].mxu1  ;;  %1396 = vmatmul.mubr.msk.bf16.gmra.mrb[20].mxu1 %vm609_vm5, %v750_v48  ;;  %v741_v58 = vmax.f32 %v709_v51, 0.0 }
 0x20e   :  { %v704_v57 = vadd.f32 %v1797_v19, %v703_v56  ;;  %1412 = vmatpush3.bf16.msra.mxu1 %v1477_v45  ;;  %v739_v60 = vmax.f32 %v701_v53, 0.0 }
 0x20f   :  { %v742_v59 = vmax.f32 %v712_v55, 0.0  ;;  %1413 = vmatprep.subr.bf16.mxu1 %v1478_v14 }
 0x210   :  { %v740_v61 = vmax.f32 %v704_v57, 0.0 }
 0x211   :  { %v752_v62 = vpack.c.bf16 %v742_v59, %v741_v58 }
 0x212   :  { %v751_v63 = vpack.c.bf16 %v740_v61, %v739_v60  ;;  %v1381_v0 = vpop.f32.mrb[12].mxu1  ;;  %1414 = vmatpush3.bf16.msra.mxu1 %v1478_v14 }
 0x213   :  { %v725_v1 = vadd.f32 %v1381_v0, %v1797_v19  ;;  %v716_v2 = vpop.f32.mrb[13].mxu1 }
 0x214   :  { %v717_v3 = vadd.f32 %v1797_v19, %v716_v2  ;;  %v1382_v4 = vpop.f32.mrb[14].mxu1  ;;  %1399 = vmatprep.mubr.msk.bf16.mxu1 %vm609_vm5, %v751_v63 }
 0x215   :  { %v728_v5 = vadd.f32 %v1382_v4, %v1797_v19  ;;  %v719_v6 = vpop.f32.mrb[15].mxu1  ;;  %1400 = vmatmul.mubr.msk.bf16.gmra.mrb[24].mxu1 %vm609_vm5, %v752_v62  ;;  %v745_v8 = vmax.f32 %v725_v1, 0.0 }
 0x216   :  { %v720_v7 = vadd.f32 %v1797_v19, %v719_v6  ;;  %v743_v10 = vmax.f32 %v717_v3, 0.0 }
 0x217   :  { %v746_v9 = vmax.f32 %v728_v5, 0.0 }
 0x218   :  { %v744_v11 = vmax.f32 %v720_v7, 0.0 }
 0x219   :  { %v754_v12 = vpack.c.bf16 %v746_v9, %v745_v8  ;;  %v20_v8 = vstv %s1867_s14  ;;  %v1480_v9 = vmov 0  }
 0x21a   :  { %v753_v13 = vpack.c.bf16 %v744_v11, %v743_v10  ;;  %21 = vst [vmem:[#allocation2] sm:$0x1] %v20_v8  ;;  %1466 = vset.pattern.permute.xlu0 %v1480_v9  ;;  %v1147_v10 = vld [vmem:[%s1868_s13] sm:$0x3f] }
 0x21b   :  { %1150 = vperm.xlu0 %1466, %v1147_v10  }
 0x21c   :  { %1403 = vmatprep.mubr.msk.bf16.mxu1 %vm609_vm5, %v753_v13 }
 0x21d   :  { %1404 = vmatmul.mubr.msk.bf16.gmra.mrb[28].mxu1 %vm609_vm5, %v754_v12  ;;  %v1229_v12 = vld [vmem:[%s1869_s12] ss:$0 sm:$0xff] }
 0x221   :  { %v1162_v11 = vld [vmem:[#allocation2] sm:$0x1] }
 0x222   :  { %1165 = vperm.xlu0 %1466, %v1162_v11  }
 0x2d8   :  { %v1393_v16 = vpop.f32.mrb[16].mxu1 }
 0x2d9   :  { %v861_v17 = vadd.f32 %v1393_v16, %v1216_v15  ;;  %v852_v18 = vpop.f32.mrb[17].mxu1 }
 0x2da   :  { %v853_v19 = vadd.f32 %v1216_v15, %v852_v18  ;;  %v1394_v20 = vpop.f32.mrb[18].mxu1 }
 0x2db   :  { %v864_v21 = vadd.f32 %v1394_v20, %v1216_v15  ;;  %v855_v22 = vpop.f32.mrb[19].mxu1  ;;  %v917_v24 = vmax.f32 %v861_v17, 0.0 }
 0x2dc   :  { %v856_v23 = vadd.f32 %v1216_v15, %v855_v22  ;;  %v915_v26 = vmax.f32 %v853_v19, 0.0 }
 0x2dd   :  { %v918_v25 = vmax.f32 %v864_v21, 0.0 }
 0x2de   :  { %v916_v27 = vmax.f32 %v856_v23, 0.0 }
 0x2df   :  { %v932_v28 = vpack.c.bf16 %v918_v25, %v917_v24 }
 0x2e0   :  { %v931_v29 = vpack.c.bf16 %v916_v27, %v915_v26  ;;  %v1397_v30 = vpop.f32.mrb[20].mxu1 }
 0x2e1   :  { %v877_v31 = vadd.f32 %v1397_v30, %v1216_v15  ;;  %v868_v32 = vpop.f32.mrb[21].mxu1 }
 0x2e2   :  { %v869_v33 = vadd.f32 %v1216_v15, %v868_v32  ;;  %v1398_v34 = vpop.f32.mrb[22].mxu1  ;;  %1415 = vmatprep.mubr.msk.bf16.mxu1 %vm609_vm5, %v931_v29 }
 0x2e3   :  { %v880_v35 = vadd.f32 %v1398_v34, %v1216_v15  ;;  %v871_v36 = vpop.f32.mrb[23].mxu1  ;;  %1416 = vmatmul.mubr.msk.bf16.vlgmr.msra.gmra.mrb[32].mxu1 %vm609_vm5, %v932_v28  ;;  %v921_v38 = vmax.f32 %v877_v31, 0.0 }
 0x2e4   :  { %v872_v37 = vadd.f32 %v1216_v15, %v871_v36  ;;  %v919_v40 = vmax.f32 %v869_v33, 0.0 }
 0x2e5   :  { %v922_v39 = vmax.f32 %v880_v35, 0.0 }
 0x2e6   :  { %v920_v41 = vmax.f32 %v872_v37, 0.0 }
 0x2e7   :  { %v934_v42 = vpack.c.bf16 %v922_v39, %v921_v38 }
 0x2e8   :  { %v933_v43 = vpack.c.bf16 %v920_v41, %v919_v40  ;;  %v1401_v44 = vpop.f32.mrb[24].mxu1 }
 0x2e9   :  { %v893_v45 = vadd.f32 %v1401_v44, %v1216_v15  ;;  %v884_v46 = vpop.f32.mrb[25].mxu1 }
 0x2ea   :  { %v885_v47 = vadd.f32 %v1216_v15, %v884_v46  ;;  %v1402_v48 = vpop.f32.mrb[26].mxu1  ;;  %1419 = vmatprep.mubr.msk.bf16.mxu1 %vm609_vm5, %v933_v43 }
 0x2eb   :  { %v896_v49 = vadd.f32 %v1402_v48, %v1216_v15  ;;  %v887_v50 = vpop.f32.mrb[27].mxu1  ;;  %1420 = vmatmul.mubr.msk.bf16.gmra.mrb[36].mxu1 %vm609_vm5, %v934_v42  ;;  %v925_v52 = vmax.f32 %v893_v45, 0.0 }
 0x2ec   :  { %v888_v51 = vadd.f32 %v1216_v15, %v887_v50  ;;  %v923_v54 = vmax.f32 %v885_v47, 0.0 }
 0x2ed   :  { %v926_v53 = vmax.f32 %v896_v49, 0.0 }
 0x2ee   :  { %v924_v55 = vmax.f32 %v888_v51, 0.0 }
 0x2ef   :  { %v936_v56 = vpack.c.bf16 %v926_v53, %v925_v52 }
 0x2f0   :  { %v935_v57 = vpack.c.bf16 %v924_v55, %v923_v54  ;;  %v1405_v58 = vpop.f32.mrb[28].mxu1 }
 0x2f1   :  { %v909_v59 = vadd.f32 %v1405_v58, %v1216_v15  ;;  %v900_v60 = vpop.f32.mrb[29].mxu1 }
 0x2f2   :  { %v901_v61 = vadd.f32 %v1216_v15, %v900_v60  ;;  %v1406_v62 = vpop.f32.mrb[30].mxu1  ;;  %1423 = vmatprep.mubr.msk.bf16.mxu1 %vm609_vm5, %v935_v57 }
 0x2f3   :  { %v912_v63 = vadd.f32 %v1406_v62, %v1216_v15  ;;  %v903_v0 = vpop.f32.mrb[31].mxu1  ;;  %1424 = vmatmul.mubr.msk.bf16.gmra.mrb[40].mxu1 %vm609_vm5, %v936_v56  ;;  %v929_v2 = vmax.f32 %v909_v59, 0.0 }
 0x2f4   :  { %v904_v1 = vadd.f32 %v1216_v15, %v903_v0  ;;  %v927_v4 = vmax.f32 %v901_v61, 0.0  ;;  %v1151_v61 = vpop.permute.xlu0 %1150  ;;  %v1168_v0 = vlaneseq }
 0x2f5   :  { %v930_v3 = vmax.f32 %v912_v63, 0.0 }
 0x2f6   :  { %v928_v5 = vmax.f32 %v904_v1, 0.0 }
 0x2f7   :  { %v938_v6 = vpack.c.bf16 %v930_v3, %v929_v2 }
 0x2f8   :  { %v937_v7 = vpack.c.bf16 %v928_v5, %v927_v4  ;;  %v1169_v4 = vshrl.u32 %v1168_v0, 7  ;;  %v1166_v8 = vpop.permute.xlu0 %1165 }
 0x2fa   :  { %1427 = vmatprep.mubr.msk.bf16.mxu1 %vm609_vm5, %v937_v7  ;;  %v1170_v7 = vsub.s32 0, %v1169_v4 }
 0x2fb   :  { %1428 = vmatmul.mubr.msk.bf16.gmra.mrb[44].mxu1 %vm609_vm5, %v938_v6 }
 0x2fc   :  { %v1171_v11 = vrot.slane %v1166_v8, %v1170_v7 }
 0x3b6   :  { %v1417_v13 = vpop.f32.mrb[32].mxu1 }
 0x3b7   :  { %v1036_v14 = vpop.f32.mrb[33].mxu1  ;;  %v1045_v20 = vadd.f32 %v1417_v13, %v1229_v12 }
 0x3b8   :  { %v1418_v15 = vpop.f32.mrb[34].mxu1  ;;  %v1037_v16 = vadd.f32 %v1229_v12, %v1036_v14 }
 0x3b9   :  { %v1039_v17 = vpop.f32.mrb[35].mxu1  ;;  %v1101_v26 = vmax.f32 %v1045_v20, 0.0  ;;  %v1048_v27 = vadd.f32 %v1418_v15, %v1229_v12 }
 0x3ba   :  { %v1040_v18 = vadd.f32 %v1229_v12, %v1039_v17  ;;  %v1099_v19 = vmax.f32 %v1037_v16, 0.0 }
 0x3bb   :  { %v1102_v28 = vmax.f32 %v1048_v27, 0.0 }
 0x3bc   :  { %1115 = vxpose.xlu1.b32.start [1/16] (narrow) %v1099_v19, 8  ;;  %v1100_v21 = vmax.f32 %v1040_v18, 0.0 }
 0x3be   :  { %v1421_v22 = vpop.f32.mrb[36].mxu1 }
 0x3bf   :  { %v1052_v23 = vpop.f32.mrb[37].mxu1  ;;  %v1061_v36 = vadd.f32 %v1421_v22, %v1229_v12 }
 0x3c0   :  { %v1422_v24 = vpop.f32.mrb[38].mxu1  ;;  %1116 = vxpose.xlu1.b32.cont [2/16] (narrow) %v1100_v21, 8  ;;  %v1053_v29 = vadd.f32 %v1229_v12, %v1052_v23 }
 0x3c1   :  { %v1055_v25 = vpop.f32.mrb[39].mxu1  ;;  %v1105_v42 = vmax.f32 %v1061_v36, 0.0  ;;  %v1064_v43 = vadd.f32 %v1422_v24, %v1229_v12 }
 0x3c2   :  { %v1103_v34 = vmax.f32 %v1053_v29, 0.0  ;;  %v1056_v35 = vadd.f32 %v1229_v12, %v1055_v25 }
 0x3c3   :  { %v1106_v44 = vmax.f32 %v1064_v43, 0.0 }
 0x3c4   :  { %1117 = vxpose.xlu1.b32.cont [3/16] (narrow) %v1101_v26, 8  ;;  %v1104_v37 = vmax.f32 %v1056_v35, 0.0 }
 0x3c6   :  { %v1425_v30 = vpop.f32.mrb[40].mxu1 }
 0x3c7   :  { %v1068_v31 = vpop.f32.mrb[41].mxu1  ;;  %v1077_v48 = vadd.f32 %v1425_v30, %v1229_v12 }
 0x3c8   :  { %v1426_v32 = vpop.f32.mrb[42].mxu1  ;;  %1118 = vxpose.xlu1.b32.cont [4/16] (narrow) %v1102_v28, 8  ;;  %v1069_v45 = vadd.f32 %v1229_v12, %v1068_v31 }
 0x3c9   :  { %v1071_v33 = vpop.f32.mrb[43].mxu1  ;;  %v1109_v50 = vmax.f32 %v1077_v48, 0.0  ;;  %v1080_v51 = vadd.f32 %v1426_v32, %v1229_v12 }
 0x3ca   :  { %v1107_v46 = vmax.f32 %v1069_v45, 0.0  ;;  %v1072_v47 = vadd.f32 %v1229_v12, %v1071_v33 }
 0x3cb   :  { %v1110_v52 = vmax.f32 %v1080_v51, 0.0 }
 0x3cc   :  { %1119 = vxpose.xlu1.b32.cont [5/16] (narrow) %v1103_v34, 8  ;;  %v1108_v49 = vmax.f32 %v1072_v47, 0.0 }
 0x3ce   :  { %v1429_v38 = vpop.f32.mrb[44].mxu1 }
 0x3cf   :  { %v1084_v39 = vpop.f32.mrb[45].mxu1  ;;  %v1093_v56 = vadd.f32 %v1429_v38, %v1229_v12 }
 0x3d0   :  { %1120 = vxpose.xlu1.b32.cont [6/16] (narrow) %v1104_v37, 8  ;;  %v1430_v40 = vpop.f32.mrb[46].mxu1  ;;  %v1085_v53 = vadd.f32 %v1229_v12, %v1084_v39 }
 0x3d1   :  { %v1087_v41 = vpop.f32.mrb[47].mxu1  ;;  %v1113_v58 = vmax.f32 %v1093_v56, 0.0  ;;  %v1096_v59 = vadd.f32 %v1430_v40, %v1229_v12 }
 0x3d2   :  { %v1111_v54 = vmax.f32 %v1085_v53, 0.0  ;;  %v1088_v55 = vadd.f32 %v1229_v12, %v1087_v41 }
 0x3d3   :  { %v1114_v60 = vmax.f32 %v1096_v59, 0.0 }
 0x3d4   :  { %1121 = vxpose.xlu1.b32.cont [7/16] (narrow) %v1105_v42, 8  ;;  %v1112_v57 = vmax.f32 %v1088_v55, 0.0 }
 0x3d8   :  { %1122 = vxpose.xlu1.b32.cont [8/16] (narrow) %v1106_v44, 8 }
 0x3dc   :  { %1123 = vxpose.xlu1.b32.cont [9/16] (narrow) %v1107_v46, 8 }
 0x3e0   :  { %1124 = vxpose.xlu1.b32.cont [10/16] (narrow) %v1108_v49, 8 }
 0x3e4   :  { %1125 = vxpose.xlu1.b32.cont [11/16] (narrow) %v1109_v50, 8 }
 0x3e8   :  { %1126 = vxpose.xlu1.b32.cont [12/16] (narrow) %v1110_v52, 8 }
 0x3ec   :  { %1127 = vxpose.xlu1.b32.cont [13/16] (narrow) %v1111_v54, 8 }
 0x3f0   :  { %1128 = vxpose.xlu1.b32.cont [14/16] (narrow) %v1112_v57, 8 }
 0x3f4   :  { %1129 = vxpose.xlu1.b32.cont [15/16] (narrow) %v1113_v58, 8 }
 0x3f8   :  { %1130 = vxpose.xlu1.b32.end [16/16] (narrow) %v1114_v60, 8 }
 0x43c   :  { %v1131_v62 = vpop.trf.xlu1 }
 0x43d   :  { %v1153_v63 = vmul.f32 %v1151_v61, %v1131_v62 }
 0x43f   :  { %v1155_v1 = vsel %vm1154_vm6, %v1153_v63, 0.0 }
 0x440   :  { %v1156_v2 = vrot.slane %v1155_v1, 4 }
 0x442   :  { %v1157_v3 = vadd.f32 %v1156_v2, %v1155_v1 }
 0x444   :  { %v1158_v5 = vrot.slane %v1157_v3, 2 }
 0x446   :  { %v1159_v6 = vadd.f32 %v1158_v5, %v1157_v3 }
 0x448   :  { %v1160_v9 = vrot.slane %v1159_v6, 1 }
 0x44a   :  { %v1161_v10 = vadd.f32 %v1160_v9, %v1159_v6 }
 0x44c   :  { %v1172_v12 = vadd.f32 %v1171_v11, %v1161_v10 }
 0x44e   :  { %1173 = vst [vmem:[%s1870_s15] sm:$0x1] %v1172_v12 }

</bundles_post_ra>
